<compile_context>
chip_gen: v6e
topology: v6e:2x2x1
jax: 0.10.0
libtpu: 0.0.40
codegen_flags: <defaults>
</compile_context>

<pallas_src>
import functools

import jax
import jax.numpy as jnp
from jax.experimental import pallas as pl
from jax.experimental.pallas import tpu as pltpu

HIDDEN = 128          # hidden width of the DQN MLP (fixed by the module)
LANES = 128           # TPU lane width
_NEG_INF = -1e30      # bias value for padded output lanes (never wins argmax)


def _round_up(n, m):
    return (n + m - 1) // m * m


def _dqn_kernel(x_ref, w1_ref, b1_ref, w2_ref, b2_ref, q_ref, a_ref):
    # x:  [TB, IN_PAD]   (zero-padded features, lane-dense)
    # w1: [IN_PAD, 128]  b1: [1, 128]
    # w2: [128, OUT_PAD] b2: [1, OUT_PAD]  (pad lanes of b2 == -1e30)
    # q:  [TB, OUT_PAD]  a: [TB, 1] int32 (argmax over real output lanes)
    x = x_ref[...]
    h = jnp.tanh(
        jnp.dot(x, w1_ref[...], preferred_element_type=jnp.float32) + b1_ref[...]
    )
    q = jnp.dot(h, w2_ref[...], preferred_element_type=jnp.float32) + b2_ref[...]
    q_ref[...] = q

    # Fused argmax over the last axis (first-occurrence tie-break, like torch).
    # Padded lanes hold -1e30 so they can never be the row max.
    npad = q.shape[-1]
    col_f = jax.lax.broadcasted_iota(jnp.int32, q.shape, 1).astype(jnp.float32)
    row_max = jnp.max(q, axis=-1, keepdims=True)
    inv = jnp.where(q == row_max, float(npad) - col_f, 0.0)
    idx_f = float(npad) - jnp.max(inv, axis=-1, keepdims=True)
    a_ref[...] = idx_f.astype(jnp.int32)


@functools.partial(jax.jit, static_argnames=("block_b",))
def dqn_forward(x, w1, b1, w2, b2, *, block_b=512):
    """Fused DQN forward + argmax.

    x:  [B, n_input] float32
    w1: [n_input, 128], b1: [1, 128] (or [128])
    w2: [128, n_output], b2: [1, n_output] (or [n_output])
    Returns (q_values [B, n_output] f32, actions [B] int32).
    """
    B, n_in = x.shape
    n_out = w2.shape[1]

    in_pad = _round_up(max(n_in, 1), LANES)
    out_pad = _round_up(max(n_out, 1), LANES)

    # Batch tile: multiple of 8 sublanes; capped by block_b for large batches.
    tb = min(block_b, _round_up(B, 8))
    b_pad = _round_up(B, tb)

    # Lane/sublane padding (in a real training loop you'd pre-pad the params
    # once; done here for a self-contained wrapper — it is a tiny fused op).
    xp = jnp.zeros((b_pad, in_pad), jnp.float32).at[:B, :n_in].set(
        x.astype(jnp.float32))
    w1p = jnp.zeros((in_pad, HIDDEN), jnp.float32).at[:n_in, :].set(
        w1.astype(jnp.float32))
    b1p = jnp.reshape(b1, (1, HIDDEN)).astype(jnp.float32)
    w2p = jnp.zeros((HIDDEN, out_pad), jnp.float32).at[:, :n_out].set(
        w2.astype(jnp.float32))
    b2p = jnp.full((1, out_pad), _NEG_INF, jnp.float32).at[0, :n_out].set(
        jnp.reshape(b2, (-1,)).astype(jnp.float32))

    grid = (b_pad // tb,)

    q_pad, act = pl.pallas_call(
        _dqn_kernel,
        out_shape=(
            jax.ShapeDtypeStruct((b_pad, out_pad), jnp.float32),
            jax.ShapeDtypeStruct((b_pad, 1), jnp.int32),
        ),
        grid_spec=pltpu.PrefetchScalarGridSpec(
            num_scalar_prefetch=0,
            grid=grid,
            in_specs=[
                pl.BlockSpec((tb, in_pad), lambda i: (i, 0)),        # x tile
                pl.BlockSpec((in_pad, HIDDEN), lambda i: (0, 0)),    # w1 resident
                pl.BlockSpec((1, HIDDEN), lambda i: (0, 0)),         # b1 resident
                pl.BlockSpec((HIDDEN, out_pad), lambda i: (0, 0)),   # w2 resident
                pl.BlockSpec((1, out_pad), lambda i: (0, 0)),        # b2 resident
            ],
            out_specs=(
                pl.BlockSpec((tb, out_pad), lambda i: (i, 0)),       # Q tile
                pl.BlockSpec((tb, 1), lambda i: (i, 0)),             # action tile
            ),
        ),
        compiler_params=pltpu.CompilerParams(
            dimension_semantics=("parallel",),   # shard batch tiles across TCs
        ),
    )(xp, w1p, b1p, w2p, b2p)

    return q_pad[:B, :n_out], act[:B, 0]


def init_dqn_params(key, n_input, n_output, hidden=HIDDEN):
    """Deterministic init mimicking torch.nn.Linear's default
    U(-1/sqrt(fan_in), 1/sqrt(fan_in)); weights stored [in, out]."""
    k1, k2, k3, k4 = jax.random.split(key, 4)
    bound1 = 1.0 / jnp.sqrt(n_input)
    bound2 = 1.0 / jnp.sqrt(hidden)
    w1 = jax.random.uniform(k1, (n_input, hidden), jnp.float32, -bound1, bound1)
    b1 = jax.random.uniform(k2, (1, hidden), jnp.float32, -bound1, bound1)
    w2 = jax.random.uniform(k3, (hidden, n_output), jnp.float32, -bound2, bound2)
    b2 = jax.random.uniform(k4, (1, n_output), jnp.float32, -bound2, bound2)
    return w1, b1, w2, b2


if __name__ == "__main__":
    key = jax.random.PRNGKey(0)
    kx, kp = jax.random.split(key)

    # Small shapes consistent with a DQN on a vector observation
    # (CartPole-like: 4 obs dims, 2 actions).
    batch, n_input, n_output = 2, 4, 2

    x = jax.random.normal(kx, (batch, n_input), dtype=jnp.float32)
    w1, b1, w2, b2 = init_dqn_params(kp, n_input, n_output)

    q, act = dqn_forward(x, w1, b1, w2, b2)
    jax.block_until_ready((q, act))

    # Reference (same semantics as the torch Sequential + argmax in `act`).
    q_ref = jnp.tanh(x @ w1 + b1) @ w2 + b2
    act_ref = jnp.argmax(q_ref, axis=-1)

    assert q.shape == (batch, n_output)
    assert act.shape == (batch,)
    assert jnp.allclose(q, q_ref, atol=1e-5, rtol=1e-5)
    assert jnp.array_equal(act, act_ref.astype(jnp.int32))

    # `DQN.act(obs)` equivalent: single observation -> fused action index.
    obs = x[0]
    _, a0 = dqn_forward(obs[None, :], w1, b1, w2, b2)
    assert int(a0[0]) == int(act_ref[0])

    print("KERNEL_OK")
</pallas_src>

<mosaic_0001>
module attributes {stable_mosaic.version = 11 : i64} {
  func.func @_dqn_kernel(%arg0: i32, %arg1: memref<8x128xf32, #tpu.memory_space<vmem>>, %arg2: memref<128x128xf32, #tpu.memory_space<vmem>>, %arg3: memref<1x128xf32, #tpu.memory_space<vmem>>, %arg4: memref<128x128xf32, #tpu.memory_space<vmem>>, %arg5: memref<1x128xf32, #tpu.memory_space<vmem>>, %arg6: memref<8x128xf32, #tpu.memory_space<vmem>>, %arg7: memref<8x1xi32, #tpu.memory_space<vmem>>) attributes {dimension_semantics = [#tpu.dimension_semantics<parallel>], iteration_bounds = array<i64: 1>, scalar_prefetch = 0 : i64, scratch_operands = 0 : i64, tpu.core_type = #tpu.core_type<tc>, window_params = [{transform_indices = @transform_0, window_bounds = array<i64: 8, 128>}, {pipeline_mode = #tpu.pipeline_mode<synchronous>, transform_indices = @transform_1, window_bounds = array<i64: 128, 128>}, {pipeline_mode = #tpu.pipeline_mode<synchronous>, transform_indices = @transform_2, window_bounds = array<i64: 1, 128>}, {pipeline_mode = #tpu.pipeline_mode<synchronous>, transform_indices = @transform_3, window_bounds = array<i64: 128, 128>}, {pipeline_mode = #tpu.pipeline_mode<synchronous>, transform_indices = @transform_4, window_bounds = array<i64: 1, 128>}, {transform_indices = @transform_5, window_bounds = array<i64: 8, 128>}, {transform_indices = @transform_6, window_bounds = array<i64: 8, 1>}]} {
    %c0 = arith.constant 0 : index
    %c0_0 = arith.constant 0 : index
    %0 = vector.load %arg1[%c0, %c0_0] : memref<8x128xf32, #tpu.memory_space<vmem>>, vector<8x128xf32>
    %c0_1 = arith.constant 0 : index
    %c0_2 = arith.constant 0 : index
    %1 = vector.load %arg2[%c0_1, %c0_2] : memref<128x128xf32, #tpu.memory_space<vmem>>, vector<128x128xf32>
    %cst = arith.constant dense<0.000000e+00> : vector<8x128xf32>
    %2 = tpu.matmul %0, %1, %cst {dimension_numbers = #tpu.dot_dimension_numbers<[1], [0], [0], [1], [0, 0, 1, 1], [], []>} : vector<8x128xf32>, vector<128x128xf32>, vector<8x128xf32> -> vector<8x128xf32>
    %c0_3 = arith.constant 0 : index
    %c0_4 = arith.constant 0 : index
    %3 = vector.load %arg3[%c0_3, %c0_4] : memref<1x128xf32, #tpu.memory_space<vmem>>, vector<1x128xf32>
    %4 = vector.broadcast %3 : vector<1x128xf32> to vector<8x128xf32>
    %5 = arith.addf %2, %4 : vector<8x128xf32>
    %6 = math.tanh %5 : vector<8x128xf32>
    %c0_5 = arith.constant 0 : index
    %c0_6 = arith.constant 0 : index
    %7 = vector.load %arg4[%c0_5, %c0_6] : memref<128x128xf32, #tpu.memory_space<vmem>>, vector<128x128xf32>
    %cst_7 = arith.constant dense<0.000000e+00> : vector<8x128xf32>
    %8 = tpu.matmul %6, %7, %cst_7 {dimension_numbers = #tpu.dot_dimension_numbers<[1], [0], [0], [1], [0, 0, 1, 1], [], []>} : vector<8x128xf32>, vector<128x128xf32>, vector<8x128xf32> -> vector<8x128xf32>
    %c0_8 = arith.constant 0 : index
    %c0_9 = arith.constant 0 : index
    %9 = vector.load %arg5[%c0_8, %c0_9] : memref<1x128xf32, #tpu.memory_space<vmem>>, vector<1x128xf32>
    %10 = vector.broadcast %9 : vector<1x128xf32> to vector<8x128xf32>
    %11 = arith.addf %8, %10 : vector<8x128xf32>
    %c0_10 = arith.constant 0 : index
    %c0_11 = arith.constant 0 : index
    %12 = vector.load %arg6[%c0_10, %c0_11] : memref<8x128xf32, #tpu.memory_space<vmem>>, vector<8x128xf32>
    tpu.vector_store %arg6[%c0_10, %c0_11], %11 {strides = array<i32>} : memref<8x128xf32, #tpu.memory_space<vmem>>, vector<8x128xf32>,
    %13 = tpu.iota {dimensions = array<i32: 1>} : vector<8x128xi32>
    %14 = arith.sitofp %13 : vector<8x128xi32> to vector<8x128xf32>
    %cst_12 = arith.constant dense<0xFF800000> : vector<8xf32>
    %15 = vector.multi_reduction <maximumf>, %11, %cst_12 [1] : vector<8x128xf32> to vector<8xf32>
    %16 = vector.shape_cast %15 : vector<8xf32> to vector<8x1xf32>
    %17 = vector.broadcast %16 : vector<8x1xf32> to vector<8x128xf32>
    %18 = arith.cmpf oeq, %11, %17 : vector<8x128xf32>
    %cst_13 = arith.constant 1.280000e+02 : f32
    %19 = vector.broadcast %cst_13 : f32 to vector<8x128xf32>
    %20 = arith.subf %19, %14 : vector<8x128xf32>
    %cst_14 = arith.constant 0.000000e+00 : f32
    %21 = vector.broadcast %cst_14 : f32 to vector<8x128xf32>
    %22 = arith.select %18, %20, %21 : vector<8x128xi1>, vector<8x128xf32>
    %cst_15 = arith.constant dense<0xFF800000> : vector<8xf32>
    %23 = vector.multi_reduction <maximumf>, %22, %cst_15 [1] : vector<8x128xf32> to vector<8xf32>
    %24 = vector.shape_cast %23 : vector<8xf32> to vector<8x1xf32>
    %cst_16 = arith.constant 1.280000e+02 : f32
    %25 = vector.broadcast %cst_16 : f32 to vector<8x1xf32>
    %26 = arith.subf %25, %24 : vector<8x1xf32>
    %27 = arith.fptosi %26 : vector<8x1xf32> to vector<8x1xi32>
    %c0_17 = arith.constant 0 : index
    %c0_18 = arith.constant 0 : index
    %28 = vector.load %arg7[%c0_17, %c0_18] : memref<8x1xi32, #tpu.memory_space<vmem>>, vector<8x1xi32>
    tpu.vector_store %arg7[%c0_17, %c0_18], %27 {strides = array<i32>} : memref<8x1xi32, #tpu.memory_space<vmem>>, vector<8x1xi32>,
    return
  }
  func.func @transform_0(%arg0: i32) -> (i32, i32) {
    %c0_i32 = arith.constant 0 : i32
    %c0_i32_0 = arith.constant 0 : i32
    return %arg0, %c0_i32 : i32, i32
  }
  func.func @transform_1(%arg0: i32) -> (i32, i32) {
    %c0_i32 = arith.constant 0 : i32
    %c0_i32_0 = arith.constant 0 : i32
    %c0_i32_1 = arith.constant 0 : i32
    return %c0_i32, %c0_i32_0 : i32, i32
  }
  func.func @transform_2(%arg0: i32) -> (i32, i32) {
    %c0_i32 = arith.constant 0 : i32
    %c0_i32_0 = arith.constant 0 : i32
    %c0_i32_1 = arith.constant 0 : i32
    return %c0_i32, %c0_i32_0 : i32, i32
  }
  func.func @transform_3(%arg0: i32) -> (i32, i32) {
    %c0_i32 = arith.constant 0 : i32
    %c0_i32_0 = arith.constant 0 : i32
    %c0_i32_1 = arith.constant 0 : i32
    return %c0_i32, %c0_i32_0 : i32, i32
  }
  func.func @transform_4(%arg0: i32) -> (i32, i32) {
    %c0_i32 = arith.constant 0 : i32
    %c0_i32_0 = arith.constant 0 : i32
    %c0_i32_1 = arith.constant 0 : i32
    return %c0_i32, %c0_i32_0 : i32, i32
  }
  func.func @transform_5(%arg0: i32) -> (i32, i32) {
    %c0_i32 = arith.constant 0 : i32
    %c0_i32_0 = arith.constant 0 : i32
    return %arg0, %c0_i32 : i32, i32
  }
  func.func @transform_6(%arg0: i32) -> (i32, i32) {
    %c0_i32 = arith.constant 0 : i32
    %c0_i32_0 = arith.constant 0 : i32
    return %arg0, %c0_i32 : i32, i32
  }
}

</mosaic_0001>

<bundles_post_ra>
// kernel: dqn_forward.1
= control target key start
LH: loop header
LB: loop body
LE: loop exit
PB: predicated region body
PF: predicated region fallthrough
CT: control target
= control target key end

     0   :  { %v345_v0 = vmov 0.0   ;;  %vm346_vm0 = vmmov 0   ;;  %v211_v43 = vlaneseq  ;;  %vm223_vm2 = vcmask 7168   ;;  %s527_s1 = inlined_call_operand.vmem [shape: f32[128,128], index: 1, kind: input, shape index: {}]   ;;  %s528_s3 = inlined_call_operand.vmem [shape: f32[128,128], index: 3, kind: input, shape index: {}]   ;;  %s529_s0 = inlined_call_operand.vmem [shape: f32[8,128], index: 0, kind: input, shape index: {}]   ;;  %s530_s2 = inlined_call_operand.vmem [shape: f32[1,128], index: 2, kind: input, shape index: {}]   ;;  %s531_s4 = inlined_call_operand.vmem [shape: f32[1,128], index: 4, kind: input, shape index: {}]   ;;  %s532_s5 = inlined_call_operand.vmem [shape: f32[8,128], index: 5, kind: output, shape index: {0}]   ;;  %s533_s6 = inlined_call_operand.vmem [shape: s32[8,1], index: 6, kind: output, shape index: {1}]  }
   0x1   :  { %269 = vmatprep.subr.mxu0 %v345_v0  ;;  %v38_v1 = vld [vmem:[%s527_s1 + $0x78] sm:$0xff]  ;;  %v37_v2 = vld [vmem:[%s527_s1 + $0x70] sm:$0xff]  ;;  %301 = vmatprep.mubr.msk.f32.mxu0 %vm346_vm0, %v345_v0  ;;  %v36_v3 = vld [vmem:[%s527_s1 + $0x68] sm:$0xff] }
   0x2   :  { %270 = vmatpush3.msra.mxu0 %v38_v1  ;;  %304 = vmatprep.subr.mxu1 %v345_v0  ;;  %v35_v4 = vld [vmem:[%s527_s1 + $0x60] sm:$0xff]  ;;  %v132_v5 = vld [vmem:[%s528_s3 + $0x78] sm:$0xff]  ;;  %v131_v7 = vld [vmem:[%s528_s3 + $0x70] sm:$0xff]  ;;  %v212_v44 = vand.u32 127, %v211_v43 }
   0x3   :  { %271 = vmatprep.subr.mxu0 %v345_v0  ;;  %336 = vmatprep.mubr.msk.f32.mxu1 %vm346_vm0, %v345_v0  ;;  %v34_v6 = vld [vmem:[%s527_s1 + $0x58] sm:$0xff]  ;;  %v130_v8 = vld [vmem:[%s528_s3 + $0x68] sm:$0xff]  ;;  %v33_v9 = vld [vmem:[%s527_s1 + $0x50] sm:$0xff] }
   0x4   :  { %272 = vmatpush3.msra.mxu0 %v37_v2  ;;  %305 = vmatpush3.msra.mxu1 %v132_v5  ;;  %v129_v10 = vld [vmem:[%s528_s3 + $0x60] sm:$0xff]  ;;  %v32_v11 = vld [vmem:[%s527_s1 + $0x48] sm:$0xff]  ;;  %v128_v12 = vld [vmem:[%s528_s3 + $0x58] sm:$0xff]  ;;  %v213_v45 = vcvt.s32.f32 %v212_v44 }
   0x5   :  { %273 = vmatprep.subr.mxu0 %v345_v0  ;;  %306 = vmatprep.subr.mxu1 %v345_v0  ;;  %v31_v13 = vld [vmem:[%s527_s1 + $0x40] sm:$0xff]  ;;  %v127_v14 = vld [vmem:[%s528_s3 + $0x50] sm:$0xff]  ;;  %v30_v15 = vld [vmem:[%s527_s1 + $0x38] sm:$0xff] }
   0x6   :  { %274 = vmatpush3.msra.mxu0 %v36_v3  ;;  %307 = vmatpush3.msra.mxu1 %v131_v7  ;;  %v126_v16 = vld [vmem:[%s528_s3 + $0x48] sm:$0xff]  ;;  %v29_v17 = vld [vmem:[%s527_s1 + $0x30] sm:$0xff]  ;;  %v27_v19 = vld [vmem:[%s527_s1 + $0x20] sm:$0xff]  ;;  %v217_v46 = vsub.f32 128.0, %v213_v45 }
   0x7   :  { %275 = vmatprep.subr.mxu0 %v345_v0  ;;  %308 = vmatprep.subr.mxu1 %v345_v0  ;;  %v28_v18 = vld [vmem:[%s527_s1 + $0x28] sm:$0xff]  ;;  %v26_v20 = vld [vmem:[%s527_s1 + $0x18] sm:$0xff]  ;;  %v25_v21 = vld [vmem:[%s527_s1 + $0x10] sm:$0xff] }
   0x8   :  { %276 = vmatpush3.msra.mxu0 %v35_v4  ;;  %309 = vmatpush3.msra.mxu1 %v130_v8  ;;  %v24_v22 = vld [vmem:[%s527_s1 + $0x8] sm:$0xff]  ;;  %v23_v23 = vld [vmem:[%s527_s1] sm:$0xff]  ;;  %v124_v26 = vld [vmem:[%s528_s3 + $0x38] sm:$0xff] }
   0x9   :  { %277 = vmatprep.subr.mxu0 %v345_v0  ;;  %310 = vmatprep.subr.mxu1 %v345_v0  ;;  %v22_v24 = vld [vmem:[%s529_s0] sm:$0xff]  ;;  %v123_v27 = vld [vmem:[%s528_s3 + $0x30] sm:$0xff]  ;;  %v122_v28 = vld [vmem:[%s528_s3 + $0x28] sm:$0xff] }
   0xa   :  { %278 = vmatpush3.msra.mxu0 %v34_v6  ;;  %311 = vmatpush3.msra.mxu1 %v129_v10  ;;  %v125_v25 = vld [vmem:[%s528_s3 + $0x40] sm:$0xff]  ;;  %v120_v30 = vld [vmem:[%s528_s3 + $0x18] sm:$0xff]  ;;  %v119_v31 = vld [vmem:[%s528_s3 + $0x10] sm:$0xff] }
   0xb   :  { %279 = vmatprep.subr.mxu0 %v345_v0  ;;  %312 = vmatprep.subr.mxu1 %v345_v0  ;;  %v121_v29 = vld [vmem:[%s528_s3 + $0x20] sm:$0xff]  ;;  %v118_v32 = vld [vmem:[%s528_s3 + $0x8] sm:$0xff] }
   0xc   :  { %280 = vmatpush3.msra.mxu0 %v33_v9  ;;  %313 = vmatpush3.msra.mxu1 %v128_v12  ;;  %v117_v33 = vld [vmem:[%s528_s3] sm:$0xff] }
   0xd   :  { %281 = vmatprep.subr.mxu0 %v345_v0  ;;  %314 = vmatprep.subr.mxu1 %v345_v0  ;;  %v233_v34 = vld [vmem:[%s530_s2] ss:$0 sm:$0xff] }
   0xe   :  { %282 = vmatpush3.msra.mxu0 %v32_v11  ;;  %315 = vmatpush3.msra.mxu1 %v127_v14  ;;  %v234_v39 = vld [vmem:[%s531_s4] ss:$0 sm:$0xff] }
   0xf   :  { %283 = vmatprep.subr.mxu0 %v345_v0  ;;  %316 = vmatprep.subr.mxu1 %v345_v0 }
  0x10   :  { %284 = vmatpush3.msra.mxu0 %v31_v13  ;;  %317 = vmatpush3.msra.mxu1 %v126_v16 }
  0x11   :  { %285 = vmatprep.subr.mxu0 %v345_v0  ;;  %318 = vmatprep.subr.mxu1 %v345_v0 }
  0x12   :  { %286 = vmatpush3.msra.mxu0 %v30_v15  ;;  %319 = vmatpush3.msra.mxu1 %v125_v25 }
  0x13   :  { %287 = vmatprep.subr.mxu0 %v345_v0  ;;  %320 = vmatprep.subr.mxu1 %v345_v0 }
  0x14   :  { %288 = vmatpush3.msra.mxu0 %v29_v17  ;;  %321 = vmatpush3.msra.mxu1 %v124_v26 }
  0x15   :  { %289 = vmatprep.subr.mxu0 %v345_v0  ;;  %322 = vmatprep.subr.mxu1 %v345_v0 }
  0x16   :  { %290 = vmatpush3.msra.mxu0 %v28_v18  ;;  %323 = vmatpush3.msra.mxu1 %v123_v27 }
  0x17   :  { %291 = vmatprep.subr.mxu0 %v345_v0  ;;  %324 = vmatprep.subr.mxu1 %v345_v0 }
  0x18   :  { %292 = vmatpush3.msra.mxu0 %v27_v19  ;;  %325 = vmatpush3.msra.mxu1 %v122_v28 }
  0x19   :  { %293 = vmatprep.subr.mxu0 %v345_v0  ;;  %326 = vmatprep.subr.mxu1 %v345_v0 }
  0x1a   :  { %294 = vmatpush3.msra.mxu0 %v26_v20  ;;  %327 = vmatpush3.msra.mxu1 %v121_v29 }
  0x1b   :  { %295 = vmatprep.subr.mxu0 %v345_v0  ;;  %328 = vmatprep.subr.mxu1 %v345_v0 }
  0x1c   :  { %296 = vmatpush3.msra.mxu0 %v25_v21  ;;  %329 = vmatpush3.msra.mxu1 %v120_v30 }
  0x1d   :  { %297 = vmatprep.subr.mxu0 %v345_v0  ;;  %330 = vmatprep.subr.mxu1 %v345_v0 }
  0x1e   :  { %298 = vmatpush3.msra.mxu0 %v24_v22  ;;  %331 = vmatpush3.msra.mxu1 %v119_v31 }
  0x1f   :  { %299 = vmatprep.subr.mxu0 %v345_v0  ;;  %332 = vmatprep.subr.mxu1 %v345_v0 }
  0x20   :  { %300 = vmatpush3.msra.mxu0 %v23_v23  ;;  %333 = vmatpush3.msra.mxu1 %v118_v32 }
  0x21   :  { %302 = vmatmul.mubr.f32.vlgmr.msra.gmra.mxu0 %v22_v24  ;;  %334 = vmatprep.subr.mxu1 %v345_v0 }
  0x22   :  { %335 = vmatpush3.msra.mxu1 %v117_v33 }
  0xe1   :  { %v112_v35 = vpop.f32.mrf.mxu0 }
  0xe2   :  { %v113_v36 = vadd.f32 %v233_v34, %v112_v35 }
  0xe3   :  { %v303_v37 = vpop.f32.mrf.mxu0 }
  0xe4   :  { %343 = vtanh.f32 %v113_v36 }
  0xf1   :  { %v344_v38 = vpop.eup %343 }
  0xf2   :  { %337 = vmatmul.mubr.f32.vlgmr.msra.gmra.mxu1 %v344_v38 }
 0x1b2   :  { %v206_v40 = vpop.f32.mrf.mxu1 }
 0x1b3   :  { %v207_v41 = vadd.f32 %v234_v39, %v206_v40 }
 0x1b4   :  { %v338_v42 = vpop.f32.mrf.mxu1 }
 0x1b5   :  { %210 = vst [vmem:[%s532_s5] sm:$0xff] %v207_v41  ;;  %214 = vmax.xlane.f32.xlu0 %v207_v41 }
 0x23e   :  { %v215_v47 = vpop.xlane.xlu0 %214 }
 0x23f   :  { %vm216_vm1 = vcmp.eq.f32.partialorder %v207_v41, %v215_v47 }
 0x240   :  { %v218_v48 = vsel %vm216_vm1, %v217_v46, 0.0 }
 0x241   :  { %219 = vmax.xlane.f32.xlu0 %v218_v48 }
 0x2ca   :  { %v220_v49 = vpop.xlane.xlu0 %219 }
 0x2cb   :  { %v221_v50 = vsub.f32 128.0, %v220_v49 }
 0x2cd   :  { %v339_v51 = vtrunc.f32 %v221_v50 }
 0x2cf   :  { %v340_v52 = vcvt.f32.s32 %v339_v51 }
 0x2d1   :  { %224 = vst.msk [vmem:[%s533_s6] sm:$0xff] %vm223_vm2, %v340_v52 }

</bundles_post_ra>
